<compile_context>
chip_gen: v6e
topology: v6e:2x2x1
jax: 0.10.0
libtpu: 0.0.40
codegen_flags: <defaults>
</compile_context>

<pallas_src>
import math

import jax
import jax.numpy as jnp
from jax.experimental import pallas as pl
from jax.experimental.pallas import tpu as pltpu

# ----------------------- config (small synthetic shapes) ----------------------
B = 2            # batch
T = 8            # sequence length
C = 128          # n_embd (lane-dense: multiple of 128)
HIDDEN = 4 * C   # 4 * n_embd
BIAS = True


# -------------------------- exact (erf-based) GELU ----------------------------
# nn.GELU() default is the exact erf formulation. Mosaic may not lower lax.erf
# directly, so we inline XLA's f32 rational approximation (accurate to ~1 ulp
# in float32): erf(x) = x * P(x^2) / Q(x^2), x clamped to [-4, 4].
_ERF_ALPHA = (2.2905065861350646e-04, 3.4082910107109506e-03,
              5.0955695062380861e-02, 1.8520832239976145e-01,
              1.1283791435190840e+00)
_ERF_BETA = (-1.1791602954361697e-07, 2.3547966471313185e-05,
             1.0179625278914885e-03, 1.4070470171167667e-02,
             1.1098505178285362e-01, 4.9746925110067538e-01, 1.0)


def _polyval(coeffs, x):
    acc = jnp.full_like(x, coeffs[0])
    for c in coeffs[1:]:
        acc = acc * x + c
    return acc


def _erf_f32(x):
    x = jnp.clip(x, -4.0, 4.0)
    x2 = x * x
    num = x * _polyval(_ERF_ALPHA, x2)
    # EUP reciprocal (separate bundle slot) instead of a VALU divide; the
    # result feeds a value that is rounded to bf16 before the second matmul,
    # so the approximate reciprocal's precision is ample here.
    return num * pl.reciprocal(_polyval(_ERF_BETA, x2), approx=True)


def _gelu_exact(x):
    return 0.5 * x * (1.0 + _erf_f32(x * (1.0 / math.sqrt(2.0))))


# --------------------------------- kernel -------------------------------------
def _mlp_kernel(x_ref, w_fc_ref, b_fc_ref, w_proj_ref, b_proj_ref, o_ref, acc_ref):
    """Grid = (row tiles, hidden chunks).  For one (bm, C) row tile:
       acc += GELU(x @ W_fc[:, k-chunk] + b_fc[k-chunk]) @ W_proj[k-chunk, :]
    and on the last chunk:  out = acc + b_proj."""
    k = pl.program_id(1)

    @pl.when(k == 0)
    def _():
        acc_ref[...] = jnp.zeros_like(acc_ref)

    # bf16 operands into the MXU, f32 accumulation; (bm, tk) hidden slab only.
    h = jnp.dot(x_ref[...], w_fc_ref[...], preferred_element_type=jnp.float32)
    h = _gelu_exact(h + b_fc_ref[...])                       # f32 elementwise
    acc_ref[...] += jnp.dot(h.astype(jnp.bfloat16), w_proj_ref[...],
                            preferred_element_type=jnp.float32)

    @pl.when(k == pl.num_programs(1) - 1)
    def _():
        # nn.Dropout: p = 0 / eval mode -> identity.
        # TODO(synk): training-mode dropout would build the keep mask in-kernel
        # with pltpu.prng_seed / pltpu.prng_random_bits.
        o_ref[...] = (acc_ref[...] + b_proj_ref[...]).astype(o_ref.dtype)


# --------------------------------- wrapper ------------------------------------
def _round_up(n, m):
    return ((n + m - 1) // m) * m


def mlp(x, w_fc, b_fc, w_proj, b_proj, *, block_m=256, block_h=512):
    """x: (B, T, C); weights (in_features, out_features), expected bf16-stored.
    Returns y = Dropout(GELU(x @ W_fc + b_fc) @ W_proj + b_proj), p=0."""
    b, t, c = x.shape
    hidden = w_fc.shape[1]
    m = b * t

    # bf16 activation stream (halves x DMA; MXU input was bf16 already).
    x2d = x.reshape(m, c).astype(jnp.bfloat16)

    # Row tile: multiple of 16 (bf16 sublane packing).
    bm = min(block_m, _round_up(m, 16))
    # v7x has 2 TensorCores: give the "parallel" row axis >= 2 steps when m allows.
    if _round_up(m, bm) // bm < 2 and bm >= 32:
        bm = _round_up(bm // 2, 16)
    m_pad = _round_up(m, bm)
    if m_pad != m:
        # TODO(synk): replace with an in-kernel masked tail store to avoid the
        # extra HBM round-trip on large ragged M (never triggered at these shapes).
        x2d = jnp.pad(x2d, ((0, m_pad - m), (0, 0)))

    # Hidden-axis (reduction) chunk; hidden = 4*C is always a multiple of 512
    # for lane-dense C, so this divides exactly.
    tk = min(block_h, hidden)
    assert hidden % tk == 0

    # Biases stay f32 for the VPU adds.
    b_fc_2 = b_fc.reshape(1, hidden).astype(jnp.float32)
    b_proj_2 = b_proj.reshape(1, c).astype(jnp.float32)

    grid = (m_pad // bm, hidden // tk)
    out = pl.pallas_call(
        _mlp_kernel,
        out_shape=jax.ShapeDtypeStruct((m_pad, c), x.dtype),
        grid_spec=pltpu.PrefetchScalarGridSpec(
            num_scalar_prefetch=0,
            grid=grid,
            in_specs=[
                pl.BlockSpec((bm, c), lambda i, k: (i, 0)),      # x row tile (resident over k)
                pl.BlockSpec((c, tk), lambda i, k: (0, k)),      # W_fc k-chunk
                pl.BlockSpec((1, tk), lambda i, k: (0, k)),      # b_fc k-chunk
                pl.BlockSpec((tk, c), lambda i, k: (k, 0)),      # W_proj k-chunk
                pl.BlockSpec((1, c), lambda i, k: (0, 0)),       # b_proj
            ],
            out_specs=pl.BlockSpec((bm, c), lambda i, k: (i, 0)),
            scratch_shapes=[pltpu.VMEM((bm, c), jnp.float32)],   # f32 accumulator
        ),
        compiler_params=pltpu.CompilerParams(
            dimension_semantics=("parallel", "arbitrary"),
            vmem_limit_bytes=64 * 1024 * 1024,
        ),
    )(x2d, w_fc, b_fc_2, w_proj, b_proj_2)

    return out[:m].reshape(b, t, c)


# -------------------------------- reference -----------------------------------
def _reference(x, w_fc, b_fc, w_proj, b_proj):
    """Pure-JAX reference mirroring the kernel's precision strategy
    (bf16 MXU inputs, f32 accumulation, exact-erf GELU in f32, dropout p=0)."""
    b, t, c = x.shape
    x2d = x.reshape(b * t, c)
    h = jnp.dot(x2d.astype(jnp.bfloat16), w_fc.astype(jnp.bfloat16),
                preferred_element_type=jnp.float32) + b_fc.astype(jnp.float32)[None, :]
    h = jax.nn.gelu(h, approximate=False)
    y = jnp.dot(h.astype(jnp.bfloat16), w_proj.astype(jnp.bfloat16),
                preferred_element_type=jnp.float32) + b_proj.astype(jnp.float32)[None, :]
    return y.astype(x.dtype).reshape(b, t, c)


if __name__ == "__main__":
    key = jax.random.PRNGKey(0)
    kx, k1, k2, k3, k4 = jax.random.split(key, 5)

    x = jax.random.normal(kx, (B, T, C), dtype=jnp.float32)

    # Deterministic parameter init (Linear-like scaling), (in, out) layout.
    w_fc = jax.random.normal(k1, (C, HIDDEN), dtype=jnp.float32) * (1.0 / math.sqrt(C))
    b_fc = (jax.random.normal(k2, (HIDDEN,), dtype=jnp.float32) * 0.02) if BIAS \
        else jnp.zeros((HIDDEN,), jnp.float32)
    w_proj = jax.random.normal(k3, (HIDDEN, C), dtype=jnp.float32) * (1.0 / math.sqrt(HIDDEN))
    b_proj = (jax.random.normal(k4, (C,), dtype=jnp.float32) * 0.02) if BIAS \
        else jnp.zeros((C,), jnp.float32)

    # Store the matmul weights as bf16 parameters once (no per-call cast).
    w_fc_b = w_fc.astype(jnp.bfloat16)
    w_proj_b = w_proj.astype(jnp.bfloat16)

    y = mlp(x, w_fc_b, b_fc, w_proj_b, b_proj)
    y = jax.block_until_ready(y)

    y_ref = _reference(x, w_fc_b, b_fc, w_proj_b, b_proj)
    assert y.shape == (B, T, C)
    # Tolerance budget: bf16 rounding of the hidden activations interacting
    # with the EUP approximate reciprocal in the erf denominator gives a few
    # 1e-3 of absolute output error; 1e-2 still catches any structural bug.
    assert jnp.allclose(y, y_ref, atol=1e-2, rtol=1e-2), "mismatch vs reference"

    print("KERNEL_OK")
</pallas_src>

<mosaic_0001>
module attributes {stable_mosaic.version = 11 : i64} {
  func.func @_mlp_kernel(%arg0: i32, %arg1: i32, %arg2: memref<16x128xbf16, #tpu.memory_space<vmem>>, %arg3: memref<128x512xbf16, #tpu.memory_space<vmem>>, %arg4: memref<1x512xf32, #tpu.memory_space<vmem>>, %arg5: memref<512x128xbf16, #tpu.memory_space<vmem>>, %arg6: memref<1x128xf32, #tpu.memory_space<vmem>>, %arg7: memref<16x128xf32, #tpu.memory_space<vmem>>, %arg8: memref<16x128xf32, #tpu.memory_space<vmem>>) attributes {dimension_semantics = [#tpu.dimension_semantics<parallel>, #tpu.dimension_semantics<arbitrary>], iteration_bounds = array<i64: 1, 1>, scalar_prefetch = 0 : i64, scratch_operands = 1 : i64, tpu.core_type = #tpu.core_type<tc>, window_params = [{transform_indices = @transform_0, window_bounds = array<i64: 16, 128>}, {transform_indices = @transform_1, window_bounds = array<i64: 128, 512>}, {transform_indices = @transform_2, window_bounds = array<i64: 1, 512>}, {transform_indices = @transform_3, window_bounds = array<i64: 512, 128>}, {pipeline_mode = #tpu.pipeline_mode<synchronous>, transform_indices = @transform_4, window_bounds = array<i64: 1, 128>}, {transform_indices = @transform_5, window_bounds = array<i64: 16, 128>}]} {
    %c0_i32 = arith.constant 0 : i32
    %0 = arith.cmpi eq, %arg1, %c0_i32 : i32
    %1 = arith.extui %0 : i1 to i32
    %c0_i32_0 = arith.constant 0 : i32
    %2 = arith.cmpi ne, %1, %c0_i32_0 : i32
    scf.if %2 {
      %cst_32 = arith.constant 0.000000e+00 : f32
      %65 = vector.broadcast %cst_32 : f32 to vector<16x128xf32>
      %c0_33 = arith.constant 0 : index
      %c0_34 = arith.constant 0 : index
      %66 = vector.load %arg8[%c0_33, %c0_34] : memref<16x128xf32, #tpu.memory_space<vmem>>, vector<16x128xf32>
      tpu.vector_store %arg8[%c0_33, %c0_34], %65 {strides = array<i32>} : memref<16x128xf32, #tpu.memory_space<vmem>>, vector<16x128xf32>,
    } else {
    }
    %c0 = arith.constant 0 : index
    %c0_1 = arith.constant 0 : index
    %3 = vector.load %arg2[%c0, %c0_1] : memref<16x128xbf16, #tpu.memory_space<vmem>>, vector<16x128xbf16>
    %c0_2 = arith.constant 0 : index
    %c0_3 = arith.constant 0 : index
    %4 = vector.load %arg3[%c0_2, %c0_3] : memref<128x512xbf16, #tpu.memory_space<vmem>>, vector<128x512xbf16>
    %cst = arith.constant dense<0.000000e+00> : vector<16x512xf32>
    %5 = tpu.matmul %3, %4, %cst {dimension_numbers = #tpu.dot_dimension_numbers<[1], [0], [0], [1], [0, 0, 1, 1], [], []>} : vector<16x128xbf16>, vector<128x512xbf16>, vector<16x512xf32> -> vector<16x512xf32>
    %c0_4 = arith.constant 0 : index
    %c0_5 = arith.constant 0 : index
    %6 = vector.load %arg4[%c0_4, %c0_5] : memref<1x512xf32, #tpu.memory_space<vmem>>, vector<1x512xf32>
    %7 = vector.broadcast %6 : vector<1x512xf32> to vector<16x512xf32>
    %8 = arith.addf %5, %7 : vector<16x512xf32>
    %cst_6 = arith.constant 5.000000e-01 : f32
    %9 = vector.broadcast %cst_6 : f32 to vector<16x512xf32>
    %10 = arith.mulf %9, %8 : vector<16x512xf32>
    %cst_7 = arith.constant 0.707106769 : f32
    %11 = vector.broadcast %cst_7 : f32 to vector<16x512xf32>
    %12 = arith.mulf %8, %11 : vector<16x512xf32>
    %cst_8 = arith.constant -4.000000e+00 : f32
    %cst_9 = arith.constant 4.000000e+00 : f32
    %13 = vector.broadcast %cst_8 : f32 to vector<16x512xf32>
    %14 = arith.maximumf %13, %12 : vector<16x512xf32>
    %15 = vector.broadcast %cst_9 : f32 to vector<16x512xf32>
    %16 = arith.minimumf %15, %14 : vector<16x512xf32>
    %17 = arith.mulf %16, %16 : vector<16x512xf32>
    %cst_10 = arith.constant 2.29050653E-4 : f32
    %18 = vector.broadcast %cst_10 : f32 to vector<16x512xf32>
    %19 = arith.mulf %18, %17 : vector<16x512xf32>
    %cst_11 = arith.constant 0.00340829091 : f32
    %20 = vector.broadcast %cst_11 : f32 to vector<16x512xf32>
    %21 = arith.addf %19, %20 : vector<16x512xf32>
    %22 = arith.mulf %21, %17 : vector<16x512xf32>
    %cst_12 = arith.constant 0.0509556942 : f32
    %23 = vector.broadcast %cst_12 : f32 to vector<16x512xf32>
    %24 = arith.addf %22, %23 : vector<16x512xf32>
    %25 = arith.mulf %24, %17 : vector<16x512xf32>
    %cst_13 = arith.constant 0.185208321 : f32
    %26 = vector.broadcast %cst_13 : f32 to vector<16x512xf32>
    %27 = arith.addf %25, %26 : vector<16x512xf32>
    %28 = arith.mulf %27, %17 : vector<16x512xf32>
    %cst_14 = arith.constant 1.12837911 : f32
    %29 = vector.broadcast %cst_14 : f32 to vector<16x512xf32>
    %30 = arith.addf %28, %29 : vector<16x512xf32>
    %31 = arith.mulf %16, %30 : vector<16x512xf32>
    %cst_15 = arith.constant -1.17916031E-7 : f32
    %32 = vector.broadcast %cst_15 : f32 to vector<16x512xf32>
    %33 = arith.mulf %32, %17 : vector<16x512xf32>
    %cst_16 = arith.constant 2.35479656E-5 : f32
    %34 = vector.broadcast %cst_16 : f32 to vector<16x512xf32>
    %35 = arith.addf %33, %34 : vector<16x512xf32>
    %36 = arith.mulf %35, %17 : vector<16x512xf32>
    %cst_17 = arith.constant 0.00101796258 : f32
    %37 = vector.broadcast %cst_17 : f32 to vector<16x512xf32>
    %38 = arith.addf %36, %37 : vector<16x512xf32>
    %39 = arith.mulf %38, %17 : vector<16x512xf32>
    %cst_18 = arith.constant 0.0140704699 : f32
    %40 = vector.broadcast %cst_18 : f32 to vector<16x512xf32>
    %41 = arith.addf %39, %40 : vector<16x512xf32>
    %42 = arith.mulf %41, %17 : vector<16x512xf32>
    %cst_19 = arith.constant 0.110985048 : f32
    %43 = vector.broadcast %cst_19 : f32 to vector<16x512xf32>
    %44 = arith.addf %42, %43 : vector<16x512xf32>
    %45 = arith.mulf %44, %17 : vector<16x512xf32>
    %cst_20 = arith.constant 0.497469246 : f32
    %46 = vector.broadcast %cst_20 : f32 to vector<16x512xf32>
    %47 = arith.addf %45, %46 : vector<16x512xf32>
    %48 = arith.mulf %47, %17 : vector<16x512xf32>
    %cst_21 = arith.constant 1.000000e+00 : f32
    %49 = vector.broadcast %cst_21 : f32 to vector<16x512xf32>
    %50 = arith.addf %48, %49 : vector<16x512xf32>
    %51 = tpu.reciprocal %50 {approx = true} : vector<16x512xf32> -> vector<16x512xf32>
    %52 = arith.mulf %31, %51 : vector<16x512xf32>
    %cst_22 = arith.constant 1.000000e+00 : f32
    %53 = vector.broadcast %cst_22 : f32 to vector<16x512xf32>
    %54 = arith.addf %53, %52 : vector<16x512xf32>
    %55 = arith.mulf %10, %54 : vector<16x512xf32>
    %c0_23 = arith.constant 0 : index
    %c0_24 = arith.constant 0 : index
    %56 = vector.load %arg8[%c0_23, %c0_24] : memref<16x128xf32, #tpu.memory_space<vmem>>, vector<16x128xf32>
    %57 = arith.truncf %55 : vector<16x512xf32> to vector<16x512xbf16>
    %c0_25 = arith.constant 0 : index
    %c0_26 = arith.constant 0 : index
    %58 = vector.load %arg5[%c0_25, %c0_26] : memref<512x128xbf16, #tpu.memory_space<vmem>>, vector<512x128xbf16>
    %cst_27 = arith.constant dense<0.000000e+00> : vector<16x128xf32>
    %59 = tpu.matmul %57, %58, %cst_27 {dimension_numbers = #tpu.dot_dimension_numbers<[1], [0], [0], [1], [0, 0, 1, 1], [], []>} : vector<16x512xbf16>, vector<512x128xbf16>, vector<16x128xf32> -> vector<16x128xf32>
    %60 = arith.addf %56, %59 : vector<16x128xf32>
    %c0_28 = arith.constant 0 : index
    %c0_29 = arith.constant 0 : index
    %61 = vector.load %arg8[%c0_28, %c0_29] : memref<16x128xf32, #tpu.memory_space<vmem>>, vector<16x128xf32>
    tpu.vector_store %arg8[%c0_28, %c0_29], %60 {strides = array<i32>} : memref<16x128xf32, #tpu.memory_space<vmem>>, vector<16x128xf32>,
    %c0_i32_30 = arith.constant 0 : i32
    %62 = arith.cmpi eq, %arg1, %c0_i32_30 : i32
    %63 = arith.extui %62 : i1 to i32
    %c0_i32_31 = arith.constant 0 : i32
    %64 = arith.cmpi ne, %63, %c0_i32_31 : i32
    scf.if %64 {
      %c0_32 = arith.constant 0 : index
      %c0_33 = arith.constant 0 : index
      %65 = vector.load %arg8[%c0_32, %c0_33] : memref<16x128xf32, #tpu.memory_space<vmem>>, vector<16x128xf32>
      %c0_34 = arith.constant 0 : index
      %c0_35 = arith.constant 0 : index
      %66 = vector.load %arg6[%c0_34, %c0_35] : memref<1x128xf32, #tpu.memory_space<vmem>>, vector<1x128xf32>
      %67 = vector.broadcast %66 : vector<1x128xf32> to vector<16x128xf32>
      %68 = arith.addf %65, %67 : vector<16x128xf32>
      %c0_36 = arith.constant 0 : index
      %c0_37 = arith.constant 0 : index
      %69 = vector.load %arg7[%c0_36, %c0_37] : memref<16x128xf32, #tpu.memory_space<vmem>>, vector<16x128xf32>
      tpu.vector_store %arg7[%c0_36, %c0_37], %68 {strides = array<i32>} : memref<16x128xf32, #tpu.memory_space<vmem>>, vector<16x128xf32>,
    } else {
    }
    return
  }
  func.func @transform_0(%arg0: i32, %arg1: i32) -> (i32, i32) {
    %c0_i32 = arith.constant 0 : i32
    %c0_i32_0 = arith.constant 0 : i32
    return %arg0, %c0_i32 : i32, i32
  }
  func.func @transform_1(%arg0: i32, %arg1: i32) -> (i32, i32) {
    %c0_i32 = arith.constant 0 : i32
    %c0_i32_0 = arith.constant 0 : i32
    return %c0_i32, %arg1 : i32, i32
  }
  func.func @transform_2(%arg0: i32, %arg1: i32) -> (i32, i32) {
    %c0_i32 = arith.constant 0 : i32
    %c0_i32_0 = arith.constant 0 : i32
    return %c0_i32, %arg1 : i32, i32
  }
  func.func @transform_3(%arg0: i32, %arg1: i32) -> (i32, i32) {
    %c0_i32 = arith.constant 0 : i32
    %c0_i32_0 = arith.constant 0 : i32
    return %arg1, %c0_i32 : i32, i32
  }
  func.func @transform_4(%arg0: i32, %arg1: i32) -> (i32, i32) {
    %c0_i32 = arith.constant 0 : i32
    %c0_i32_0 = arith.constant 0 : i32
    %c0_i32_1 = arith.constant 0 : i32
    return %c0_i32, %c0_i32_0 : i32, i32
  }
  func.func @transform_5(%arg0: i32, %arg1: i32) -> (i32, i32) {
    %c0_i32 = arith.constant 0 : i32
    %c0_i32_0 = arith.constant 0 : i32
    return %arg0, %c0_i32 : i32, i32
  }
}

</mosaic_0001>

<bundles_post_ra>
// kernel: tpu_custom_call.1
= control target key start
LH: loop header
LB: loop body
LE: loop exit
PB: predicated region body
PF: predicated region fallthrough
CT: control target
= control target key end

     0   :  { %10 = vsyncpa [#allocation4], 0  ;;  %s1575_s0 = inlined_call_operand.hbm [shape: bf16[16,128], index: 0, kind: input, shape index: {}]   ;;  %s1576_s1 = inlined_call_operand.hbm [shape: bf16[128,512], index: 1, kind: input, shape index: {}]   ;;  %s1577_s2 = inlined_call_operand.hbm [shape: f32[1,512], index: 2, kind: input, shape index: {}]   ;;  %s1578_s3 = inlined_call_operand.hbm [shape: bf16[512,128], index: 3, kind: input, shape index: {}]   ;;  %s1579_s4 = inlined_call_operand.vmem [shape: f32[1,128], index: 4, kind: input, shape index: {}]   ;;  %s1580_s5 = inlined_call_operand.hbm [shape: f32[16,128], index: 5, kind: output, shape index: {}]  }
   0x1   :  { %11 = vsyncpa [#allocation7], 0 }
   0x2   :  { %12 = vsyncpa [#allocation10], 0 }
   0x3   :  { %13 = vsyncpa [#allocation5], 0  ;;  %s1347_s18 = smov [#allocation6]  }
   0x4   :  { %s31_s19 = sshll.u32 %s1347_s18, 4  ;;  %s32_s19 = int_to_ptr.vmem [resolvable:$true] %s31_s19 }
   0x5   :  { %s1247_s20 = scalar_lea.vmem %s32_s19, 4096  ;;  %p1252_p1 = scmp.lt.s32.totalorder %s32_s19, %s32_s19 }
   0x6   :  { %p1248_p0 = scmp.ne.s32.totalorder %s32_s19, %s1247_s20  ;;  %p1253_p2 = scmp.lt.s32.totalorder %s1247_s20, %s1247_s20 }
   0x8   :  { %p1254_p3 = por %p1253_p2, %p1252_p1 }
   0xa   :  { %p1255_p4 = pnand %p1254_p3, %p1248_p0 }
   0xc   :  { %1258 = shalt.err (!%p1255_p4)
}
   0xd   :  { %s1348_s21 = smov 256   ;;  %s1349_s22 = smov 16  }
   0xe   :  { %37 = dma.hbm_to_vmem [thread:$0]  %s1576_s1, 4096, %s32_s19, [#allocation7], %s1348_s21, %s1348_s21, %s1349_s22  }
   0xf   :  { %s1350_s25 = smov [#allocation3]  }
  0x10   :  { %s19_s26 = sshll.u32 %s1350_s25, 4  ;;  %s20_s26 = int_to_ptr.vmem [resolvable:$true] %s19_s26 }
  0x11   :  { %s1267_s27 = scalar_lea.vmem %s20_s26, 128  ;;  %p1272_p6 = scmp.lt.s32.totalorder %s20_s26, %s20_s26 }
  0x12   :  { %p1268_p5 = scmp.ne.s32.totalorder %s20_s26, %s1267_s27  ;;  %p1273_p7 = scmp.lt.s32.totalorder %s1267_s27, %s1267_s27 }
  0x14   :  { %p1274_p8 = por %p1273_p7, %p1272_p6 }
  0x16   :  { %p1275_p9 = pnand %p1274_p8, %p1268_p5 }
  0x18   :  { %1278 = shalt.err (!%p1275_p9)
}
  0x19   :  { %s1351_s28 = smov 64   ;;  %s1352_s29 = smov 4  }
  0x1a   :  { %25 = dma.hbm_to_vmem [thread:$0]  %s1575_s0, 128, %s20_s26, [#allocation4], %s1351_s28, %s1351_s28, %s1352_s29  }
  0x1b   :  { %s1353_s7 = smov [#allocation8]   ;;  %s1354_s9 = smov [#allocation9]  }
  0x1c   :  { %s44_s8 = sshll.u32 %s1353_s7, 4  ;;  %s53_s1 = sshll.u32 %s1354_s9, 4  ;;  %s45_s8 = int_to_ptr.vmem [resolvable:$true] %s44_s8  ;;  %s54_s1 = int_to_ptr.vmem [resolvable:$true] %s53_s1 }
  0x1d   :  { %s1287_s10 = scalar_lea.vmem %s45_s8, 64  ;;  %p1292_p11 = scmp.lt.s32.totalorder %s45_s8, %s45_s8 }
  0x1e   :  { %p1288_p10 = scmp.ne.s32.totalorder %s45_s8, %s1287_s10  ;;  %p1293_p12 = scmp.lt.s32.totalorder %s1287_s10, %s1287_s10 }
  0x20   :  { %p1294_p13 = por %p1293_p12, %p1292_p11 }
  0x22   :  { %p1295_p0 = pnand %p1294_p13, %p1288_p10 }
  0x24   :  { %1298 = shalt.err (!%p1295_p0)
}
  0x25   :  { %47 = dma.hbm_to_vmem [thread:$0]  %s1577_s2, 64, %s45_s8, [#allocation7]  }
  0x26   :  { %s1307_s13 = scalar_lea.vmem %s54_s1, 4096  ;;  %p1312_p2 = scmp.lt.s32.totalorder %s54_s1, %s54_s1 }
  0x27   :  { %p1308_p1 = scmp.ne.s32.totalorder %s54_s1, %s1307_s13  ;;  %p1313_p3 = scmp.lt.s32.totalorder %s1307_s13, %s1307_s13 }
  0x29   :  { %p1314_p4 = por %p1313_p3, %p1312_p2 }
  0x2b   :  { %p1315_p5 = pnand %p1314_p4, %p1308_p1 }
  0x2d   :  { %1318 = shalt.err (!%p1315_p5)
}
  0x2e   :  { %59 = dma.hbm_to_vmem [thread:$0]  %s1578_s3, 4096, %s54_s1, [#allocation10], %s1351_s28, %s1351_s28, %s1352_s29  }
  0x2f   :  { %1339 = dma.done.wait [#allocation4], 128  }
  0x30   :  { %1340 = vsyncadd [#allocation4], 4294967168 }
  0x31   :  { %1341 = dma.done.wait [#allocation7], 4160  }
  0x32   :  { %1342 = vsyncadd [#allocation7], 4294963136 }
  0x33   :  { %1343 = dma.done.wait [#allocation10], 4096  }
  0x34   :  { %1344 = vsyncadd [#allocation10], 4294963200  ;;  %v1355_v0 = vmov 0   ;;  %v1142_v1 = vld [vmem:[#allocation6 + $0xe4] ss:$16 sps:$4 sm:$0xff]   ;;  %v1190_v33 = vld [vmem:[#allocation3] sm:$0xff]  }
  0x35   :  { %335 = vmatprep.mubr.bf16.mxu0 %v1355_v0  ;;  %378 = vmatprep.mubr.bf16.mxu1 %v1355_v0  ;;  %v1144_v2 = vld [vmem:[#allocation6 + $0xec] ss:$16 sps:$4 sm:$0xff]   ;;  %v1146_v3 = vld [vmem:[#allocation6 + $0xe0] ss:$16 sps:$4 sm:$0xff]   ;;  %v1147_v4 = vld [vmem:[#allocation6 + $0xe8] ss:$16 sps:$4 sm:$0xff]  }
  0x36   :  { %303 = vmatprep.subr.bf16.mxu0 %v1142_v1  ;;  %346 = vmatprep.subr.bf16.mxu1 %v1144_v2  ;;  %v1148_v5 = vld [vmem:[#allocation6 + $0xc4] ss:$16 sps:$4 sm:$0xff]   ;;  %v1150_v6 = vld [vmem:[#allocation6 + $0xcc] ss:$16 sps:$4 sm:$0xff]   ;;  %v1152_v7 = vld [vmem:[#allocation6 + $0xc0] ss:$16 sps:$4 sm:$0xff]   ;;  %v117_v2 = vlaneseq }
  0x37   :  { %304 = vmatpush1.bf16.msra.mxu0 %v1146_v3  ;;  %347 = vmatpush1.bf16.msra.mxu1 %v1147_v4  ;;  %v1153_v8 = vld [vmem:[#allocation6 + $0xc8] ss:$16 sps:$4 sm:$0xff]   ;;  %v1154_v9 = vld [vmem:[#allocation6 + $0xa4] ss:$16 sps:$4 sm:$0xff]   ;;  %v1156_v10 = vld [vmem:[#allocation6 + $0xac] ss:$16 sps:$4 sm:$0xff]  }
  0x38   :  { %305 = vmatprep.subr.bf16.mxu0 %v1148_v5  ;;  %348 = vmatprep.subr.bf16.mxu1 %v1150_v6  ;;  %v1158_v11 = vld [vmem:[#allocation6 + $0xa0] ss:$16 sps:$4 sm:$0xff]   ;;  %v1159_v12 = vld [vmem:[#allocation6 + $0xa8] ss:$16 sps:$4 sm:$0xff]   ;;  %v1160_v13 = vld [vmem:[#allocation6 + $0x84] ss:$16 sps:$4 sm:$0xff]  }
  0x39   :  { %v1162_v14 = vld [vmem:[#allocation6 + $0x8c] ss:$16 sps:$4 sm:$0xff]   ;;  %v1164_v15 = vld [vmem:[#allocation6 + $0x80] ss:$16 sps:$4 sm:$0xff]   ;;  %v1165_v16 = vld [vmem:[#allocation6 + $0x88] ss:$16 sps:$4 sm:$0xff]  }
  0x3a   :  { %v1166_v17 = vld [vmem:[#allocation6 + $0x64] ss:$16 sps:$4 sm:$0xff]   ;;  %v1168_v18 = vld [vmem:[#allocation6 + $0x6c] ss:$16 sps:$4 sm:$0xff]   ;;  %v1170_v19 = vld [vmem:[#allocation6 + $0x60] ss:$16 sps:$4 sm:$0xff]  }
  0x3b   :  { %306 = vmatpush1.bf16.msra.mxu0 %v1152_v7  ;;  %349 = vmatpush1.bf16.msra.mxu1 %v1153_v8  ;;  %v1171_v20 = vld [vmem:[#allocation6 + $0x68] ss:$16 sps:$4 sm:$0xff]   ;;  %v1172_v21 = vld [vmem:[#allocation6 + $0x44] ss:$16 sps:$4 sm:$0xff]   ;;  %v1174_v22 = vld [vmem:[#allocation6 + $0x4c] ss:$16 sps:$4 sm:$0xff]  }
  0x3c   :  { %307 = vmatprep.subr.bf16.mxu0 %v1154_v9  ;;  %350 = vmatprep.subr.bf16.mxu1 %v1156_v10  ;;  %v1176_v23 = vld [vmem:[#allocation6 + $0x40] ss:$16 sps:$4 sm:$0xff]   ;;  %v1177_v24 = vld [vmem:[#allocation6 + $0x48] ss:$16 sps:$4 sm:$0xff]   ;;  %v1178_v25 = vld [vmem:[#allocation6 + $0x24] ss:$16 sps:$4 sm:$0xff]  }
  0x3d   :  { %v1180_v26 = vld [vmem:[#allocation6 + $0x2c] ss:$16 sps:$4 sm:$0xff]   ;;  %v1182_v27 = vld [vmem:[#allocation6 + $0x20] ss:$16 sps:$4 sm:$0xff]   ;;  %v1183_v28 = vld [vmem:[#allocation6 + $0x28] ss:$16 sps:$4 sm:$0xff]  }
  0x3e   :  { %v1184_v29 = vld [vmem:[#allocation6 + $0x4] ss:$16 sps:$4 sm:$0xff]   ;;  %v1186_v30 = vld [vmem:[#allocation6 + $0xc] ss:$16 sps:$4 sm:$0xff]   ;;  %v1188_v31 = vld [vmem:[#allocation6] ss:$16 sps:$4 sm:$0xff]  }
  0x3f   :  { %308 = vmatpush1.bf16.msra.mxu0 %v1158_v11  ;;  %351 = vmatpush1.bf16.msra.mxu1 %v1159_v12  ;;  %v1189_v32 = vld [vmem:[#allocation6 + $0x8] ss:$16 sps:$4 sm:$0xff]   ;;  %v1191_v34 = vld [vmem:[#allocation9 + $0x78] sm:$0xff]   ;;  %v1199_v42 = vld [vmem:[#allocation9 + $0x68] sm:$0xff]   ;;  %v118_v3 = vshrl.u32 %v117_v2, 7  ;;  %s1356_s15 = smov [#allocation11]  }
  0x40   :  { %309 = vmatprep.subr.bf16.mxu0 %v1160_v13  ;;  %352 = vmatprep.subr.bf16.mxu1 %v1162_v14  ;;  %v1192_v35 = vld [vmem:[#allocation9 + $0xf8] sm:$0xff]   ;;  %v1195_v38 = vld [vmem:[#allocation9 + $0x70] sm:$0xff]   ;;  %v1200_v43 = vld [vmem:[#allocation9 + $0xe8] sm:$0xff]   ;;  %s998_s16 = sshll.u32 %s1356_s15, 4  ;;  %s999_s16 = int_to_ptr.vmem [resolvable:$true] %s998_s16 }
  0x41   :  { %v1193_v36 = vld [vmem:[#allocation9 + $0x38] sm:$0xff]   ;;  %v1196_v39 = vld [vmem:[#allocation9 + $0xf0] sm:$0xff]   ;;  %v1201_v44 = vld [vmem:[#allocation9 + $0x28] sm:$0xff]   ;;  %v119_v4 = vsub.s32 0, %v118_v3  ;;  %v127_v6 = vsub.s32 2, %v118_v3  ;;  %v123_v7 = vsub.s32 1, %v118_v3  ;;  %p1324_p7 = scmp.lt.s32.totalorder %s999_s16, %s999_s16 }
  0x42   :  { %v1194_v37 = vld [vmem:[#allocation9 + $0xb8] sm:$0xff]   ;;  %v1197_v40 = vld [vmem:[#allocation9 + $0x30] sm:$0xff]   ;;  %v1202_v45 = vld [vmem:[#allocation9 + $0xa8] sm:$0xff]   ;;  %v131_v8 = vsub.s32 3, %v118_v3  ;;  %s1319_s17 = scalar_lea.vmem %s999_s16, 256 }
  0x43   :  { %310 = vmatpush1.bf16.msra.mxu0 %v1164_v15  ;;  %353 = vmatpush1.bf16.msra.mxu1 %v1165_v16  ;;  %v1198_v41 = vld [vmem:[#allocation9 + $0xb0] sm:$0xff]   ;;  %v1203_v46 = vld [vmem:[#allocation9 + $0x60] sm:$0xff]   ;;  %v1207_v50 = vld [vmem:[#allocation9 + $0x58] sm:$0xff]   ;;  %p1320_p6 = scmp.ne.s32.totalorder %s999_s16, %s1319_s17  ;;  %p1325_p8 = scmp.lt.s32.totalorder %s1319_s17, %s1319_s17 }
  0x44   :  { %311 = vmatprep.subr.bf16.mxu0 %v1166_v17  ;;  %354 = vmatprep.subr.bf16.mxu1 %v1168_v18  ;;  %v1204_v47 = vld [vmem:[#allocation9 + $0xe0] sm:$0xff]   ;;  %v1208_v51 = vld [vmem:[#allocation9 + $0xd8] sm:$0xff]   ;;  %v1211_v54 = vld [vmem:[#allocation9 + $0x50] sm:$0xff]  }
  0x45   :  { %v1205_v48 = vld [vmem:[#allocation9 + $0x20] sm:$0xff]   ;;  %v1209_v52 = vld [vmem:[#allocation9 + $0x18] sm:$0xff]   ;;  %v1212_v55 = vld [vmem:[#allocation9 + $0xd0] sm:$0xff]   ;;  %p1326_p9 = por %p1325_p8, %p1324_p7 }
  0x46   :  { %v1206_v49 = vld [vmem:[#allocation9 + $0xa0] sm:$0xff]   ;;  %v1210_v53 = vld [vmem:[#allocation9 + $0x98] sm:$0xff]   ;;  %v1213_v56 = vld [vmem:[#allocation9 + $0x10] sm:$0xff]  }
  0x47   :  { %312 = vmatpush1.bf16.msra.mxu0 %v1170_v19  ;;  %355 = vmatpush1.bf16.msra.mxu1 %v1171_v20  ;;  %v1214_v57 = vld [vmem:[#allocation9 + $0x90] sm:$0xff]   ;;  %v1215_v58 = vld [vmem:[#allocation9 + $0x48] sm:$0xff]   ;;  %v1219_v62 = vld [vmem:[#allocation9 + $0x40] sm:$0xff]   ;;  %p1327_p10 = pnand %p1326_p9, %p1320_p6 }
  0x48   :  { %313 = vmatprep.subr.bf16.mxu0 %v1172_v21  ;;  %356 = vmatprep.subr.bf16.mxu1 %v1174_v22  ;;  %v1216_v59 = vld [vmem:[#allocation9 + $0xc8] sm:$0xff]   ;;  %v1220_v63 = vld [vmem:[#allocation9 + $0xc0] sm:$0xff]   ;;  %v115_v5 = vld [vmem:[#allocation8] sm:$0xf] }
  0x49   :  { %v1217_v60 = vld [vmem:[#allocation9 + $0x8] sm:$0xff]   ;;  %v1221_v0 = vld [vmem:[#allocation9] sm:$0xff]   ;;  %v120_v9 = vrot.slane %v115_v5, %v119_v4  ;;  %v128_v11 = vrot.slane %v115_v5, %v127_v6  ;;  %v124_v13 = vrot.slane %v115_v5, %v123_v7  ;;  %v132_v14 = vrot.slane %v115_v5, %v131_v8 }
  0x4a   :  { %v1218_v61 = vld [vmem:[#allocation9 + $0x88] sm:$0xff]   ;;  %v1222_v1 = vld [vmem:[#allocation9 + $0x80] sm:$0xff]  }
  0x4b   :  { %314 = vmatpush1.bf16.msra.mxu0 %v1176_v23  ;;  %357 = vmatpush1.bf16.msra.mxu1 %v1177_v24 }
  0x4c   :  { %315 = vmatprep.subr.bf16.mxu0 %v1178_v25  ;;  %358 = vmatprep.subr.bf16.mxu1 %v1180_v26 }
  0x4f   :  { %316 = vmatpush1.bf16.msra.mxu0 %v1182_v27  ;;  %359 = vmatpush1.bf16.msra.mxu1 %v1183_v28 }
  0x50   :  { %317 = vmatprep.subr.bf16.mxu0 %v1184_v29  ;;  %360 = vmatprep.subr.bf16.mxu1 %v1186_v30 }
  0x53   :  { %318 = vmatpush1.bf16.msra.mxu0 %v1188_v31  ;;  %361 = vmatpush1.bf16.msra.mxu1 %v1189_v32 }
  0x54   :  { %1086 = vmatprep.subr.bf16.mxu0 %v1191_v34  ;;  %1108 = vmatprep.subr.bf16.mxu1 %v1192_v35 }
  0x56   :  { %336 = vmatmul.mubr.bf16.vlgmr.msra.gmra.mxu0 %v1190_v33  ;;  %379 = vmatmul.mubr.bf16.vlgmr.msra.gmra.mxu1 %v1190_v33 }
  0x57   :  { %1087 = vmatpush3.bf16.msra.mxu0 %v1193_v36  ;;  %1109 = vmatpush3.bf16.msra.mxu1 %v1194_v37 }
  0x58   :  { %1088 = vmatprep.subr.bf16.mxu0 %v1195_v38  ;;  %1110 = vmatprep.subr.bf16.mxu1 %v1196_v39 }
  0x5b   :  { %1089 = vmatpush3.bf16.msra.mxu0 %v1197_v40  ;;  %1111 = vmatpush3.bf16.msra.mxu1 %v1198_v41 }
  0x5c   :  { %1090 = vmatprep.subr.bf16.mxu0 %v1199_v42  ;;  %1112 = vmatprep.subr.bf16.mxu1 %v1200_v43 }
  0x5f   :  { %1091 = vmatpush3.bf16.msra.mxu0 %v1201_v44  ;;  %1113 = vmatpush3.bf16.msra.mxu1 %v1202_v45 }
  0x60   :  { %1092 = vmatprep.subr.bf16.mxu0 %v1203_v46  ;;  %1114 = vmatprep.subr.bf16.mxu1 %v1204_v47 }
  0x63   :  { %1093 = vmatpush3.bf16.msra.mxu0 %v1205_v48  ;;  %1115 = vmatpush3.bf16.msra.mxu1 %v1206_v49 }
  0x64   :  { %1094 = vmatprep.subr.bf16.mxu0 %v1207_v50  ;;  %1116 = vmatprep.subr.bf16.mxu1 %v1208_v51 }
  0x67   :  { %1095 = vmatpush3.bf16.msra.mxu0 %v1209_v52  ;;  %1117 = vmatpush3.bf16.msra.mxu1 %v1210_v53 }
  0x68   :  { %1096 = vmatprep.subr.bf16.mxu0 %v1211_v54  ;;  %1118 = vmatprep.subr.bf16.mxu1 %v1212_v55 }
  0x6b   :  { %1097 = vmatpush3.bf16.msra.mxu0 %v1213_v56  ;;  %1119 = vmatpush3.bf16.msra.mxu1 %v1214_v57 }
  0x6c   :  { %1098 = vmatprep.subr.bf16.mxu0 %v1215_v58  ;;  %1120 = vmatprep.subr.bf16.mxu1 %v1216_v59 }
  0x6f   :  { %1099 = vmatpush3.bf16.msra.mxu0 %v1217_v60  ;;  %1121 = vmatpush3.bf16.msra.mxu1 %v1218_v61 }
  0x70   :  { %1100 = vmatprep.subr.bf16.mxu0 %v1219_v62  ;;  %1122 = vmatprep.subr.bf16.mxu1 %v1220_v63 }
  0x73   :  { %1101 = vmatpush3.bf16.msra.mxu0 %v1221_v0  ;;  %1123 = vmatpush3.bf16.msra.mxu1 %v1222_v1 }
 0x116   :  { %v337_v10 = vpop.f32.mrf.mxu0  ;;  %v380_v12 = vpop.f32.mrf.mxu1 }
 0x117   :  { %v1401_v15 = vadd.f32 %v337_v10, %v120_v9  ;;  %v1404_v19 = vadd.f32 %v380_v12, %v128_v11 }
 0x118   :  { %v339_v16 = vpop.f32.mrf.mxu0  ;;  %v382_v17 = vpop.f32.mrf.mxu1 }
 0x119   :  { %v397_v18 = vmul.f32 0.70710677, %v1401_v15  ;;  %v1406_v20 = vadd.f32 %v339_v16, %v124_v13  ;;  %v1408_v21 = vadd.f32 %v382_v17, %v132_v14  ;;  %v399_v25 = vmul.f32 0.70710677, %v1404_v19 }
 0x11a   :  { %v341_v27 = vpop.f32.mrf.mxu0  ;;  %v384_v42 = vpop.f32.mrf.mxu1 }
 0x11b   :  { %v1410_v22 = vclamps-f32 %v397_v18, 4.0  ;;  %v398_v23 = vmul.f32 0.70710677, %v1406_v20  ;;  %v400_v24 = vmul.f32 0.70710677, %v1408_v21  ;;  %v1427_v31 = vadd.f32 %v341_v27, %v120_v9 }
 0x11c   :  { %v1429_v32 = vclamps-f32 %v399_v25, 4.0  ;;  %v1448_v46 = vadd.f32 %v384_v42, %v128_v11  ;;  %v343_v56 = vpop.f32.mrf.mxu0  ;;  %v386_v0 = vpop.f32.mrf.mxu1 }
 0x11d   :  { %v1415_v26 = vclamps-f32 %v398_v23, 4.0  ;;  %v1419_v28 = vmul.f32 %v1410_v22, %v1410_v22  ;;  %v1425_v30 = vclamps-f32 %v400_v24, 4.0  ;;  %v401_v36 = vmul.f32 0.70710677, %v1427_v31 }
 0x11e   :  { %v1440_v37 = vmul.f32 %v1429_v32, %v1429_v32  ;;  %v403_v52 = vmul.f32 0.70710677, %v1448_v46  ;;  %v1463_v63 = vadd.f32 %v343_v56, %v124_v13  ;;  %v1470_v7 = vadd.f32 %v386_v0, %v132_v14 }
 0x11f   :  { %v1423_v29 = vmul.f32 %v1415_v26, %v1415_v26  ;;  %v501_v34 = vmul.f32 -1.1791603e-07, %v1419_v28  ;;  %v1435_v35 = vmul.f32 %v1425_v30, %v1425_v30  ;;  %v1443_v41 = vclamps-f32 %v401_v36, 4.0 }
 0x120   :  { %v503_v43 = vmul.f32 -1.1791603e-07, %v1440_v37  ;;  %v1460_v60 = vclamps-f32 %v403_v52, 4.0  ;;  %v402_v10 = vmul.f32 0.70710677, %v1463_v63 }
 0x121   :  { %v502_v33 = vmul.f32 -1.1791603e-07, %v1423_v29  ;;  %v509_v39 = vadd.f32 2.3547966e-05, %v501_v34  ;;  %v504_v40 = vmul.f32 -1.1791603e-07, %v1435_v35  ;;  %v1452_v48 = vmul.f32 %v1443_v41, %v1443_v41 }
 0x122   :  { %v511_v49 = vadd.f32 2.3547966e-05, %v503_v43  ;;  %v1467_v2 = vmul.f32 %v1460_v60, %v1460_v60  ;;  %v1477_v17 = vclamps-f32 %v402_v10, 4.0  ;;  %v404_v14 = vmul.f32 0.70710677, %v1470_v7 }
 0x123   :  { %v510_v38 = vadd.f32 2.3547966e-05, %v502_v33  ;;  %v517_v45 = vmul.f32 %v509_v39, %v1419_v28  ;;  %v512_v47 = vadd.f32 2.3547966e-05, %v504_v40  ;;  %v505_v54 = vmul.f32 -1.1791603e-07, %v1452_v48 }
 0x124   :  { %v519_v55 = vmul.f32 %v511_v49, %v1440_v37  ;;  %v507_v6 = vmul.f32 -1.1791603e-07, %v1467_v2  ;;  %v429_v24 = vmul.f32 0.00022905065, %v1419_v28  ;;  %v1486_v33 = vmul.f32 %v1477_v17, %v1477_v17 }
 0x125   :  { %v518_v44 = vmul.f32 %v510_v38, %v1423_v29  ;;  %v525_v51 = vadd.f32 0.0010179626, %v517_v45  ;;  %v520_v53 = vmul.f32 %v512_v47, %v1435_v35  ;;  %v513_v58 = vadd.f32 2.3547966e-05, %v505_v54 }
 0x126   :  { %v527_v1 = vadd.f32 0.0010179626, %v519_v55  ;;  %v515_v12 = vadd.f32 2.3547966e-05, %v507_v6  ;;  %v430_v36 = vmul.f32 0.00022905065, %v1423_v29 }
 0x127   :  { %v526_v50 = vadd.f32 0.0010179626, %v518_v44  ;;  %v533_v59 = vmul.f32 %v525_v51, %v1419_v28  ;;  %v528_v61 = vadd.f32 0.0010179626, %v520_v53  ;;  %v521_v62 = vmul.f32 %v513_v58, %v1452_v48 }
 0x128   :  { %v535_v11 = vmul.f32 %v527_v1, %v1440_v37  ;;  %v523_v23 = vmul.f32 %v515_v12, %v1467_v2  ;;  %v1489_v42 = vclamps-f32 %v404_v14, 4.0  ;;  %v433_v44 = vmul.f32 0.00022905065, %v1452_v48 }
 0x129   :  { %v534_v57 = vmul.f32 %v526_v50, %v1423_v29  ;;  %v529_v4 = vadd.f32 0.0010179626, %v521_v62  ;;  %v541_v5 = vadd.f32 0.01407047, %v533_v59  ;;  %v536_v8 = vmul.f32 %v528_v61, %v1435_v35 }
 0x12a   :  { %v543_v34 = vadd.f32 0.01407047, %v535_v11  ;;  %v531_v38 = vadd.f32 0.0010179626, %v523_v23  ;;  %v506_v47 = vmul.f32 -1.1791603e-07, %v1486_v33  ;;  %v1502_v59 = vmul.f32 %v1489_v42, %v1489_v42 }
 0x12b   :  { %v542_v3 = vadd.f32 0.01407047, %v534_v57  ;;  %v537_v9 = vmul.f32 %v529_v4, %v1452_v48  ;;  %v549_v18 = vmul.f32 %v541_v5, %v1419_v28  ;;  %v544_v25 = vadd.f32 0.01407047, %v536_v8 }
 0x12c   :  { %v539_v45 = vmul.f32 %v531_v38, %v1467_v2  ;;  %v437_v49 = vadd.f32 0.003408291, %v429_v24  ;;  %v431_v50 = vmul.f32 0.00022905065, %v1440_v37  ;;  %v438_v52 = vadd.f32 0.003408291, %v430_v36 }
 0x12d   :  { %v550_v13 = vmul.f32 %v542_v3, %v1423_v29  ;;  %v545_v16 = vadd.f32 0.01407047, %v537_v9  ;;  %v557_v43 = vadd.f32 0.11098505, %v549_v18  ;;  %v552_v51 = vmul.f32 %v544_v25, %v1435_v35 }
 0x12e   :  { %v547_v54 = vadd.f32 0.01407047, %v539_v45  ;;  %v514_v55 = vadd.f32 2.3547966e-05, %v506_v47  ;;  %v551_v56 = vmul.f32 %v543_v34, %v1440_v37  ;;  %v432_v58 = vmul.f32 0.00022905065, %v1435_v35 }
 0x12f   :  { %v553_v27 = vmul.f32 %v545_v16, %v1452_v48  ;;  %v558_v39 = vadd.f32 0.11098505, %v550_v13  ;;  %v565_v61 = vmul.f32 %v557_v43, %v1419_v28  ;;  %v441_v62 = vadd.f32 0.003408291, %v433_v44 }
 0x130   :  { %v555_v0 = vmul.f32 %v547_v54, %v1467_v2  ;;  %v522_v1 = vmul.f32 %v514_v55, %v1486_v33  ;;  %v445_v3 = vmul.f32 %v437_v49, %v1419_v28  ;;  %v439_v4 = vadd.f32 0.003408291, %v431_v50 }
 0x131   :  { %v561_v40 = vadd.f32 0.11098505, %v553_v27  ;;  %v566_v57 = vmul.f32 %v558_v39, %v1423_v29  ;;  %v560_v5 = vadd.f32 0.11098505, %v552_v51  ;;  %v434_v6 = vmul.f32 0.00022905065, %v1486_v33 }
 0x132   :  { %v446_v8 = vmul.f32 %v438_v52, %v1423_v29  ;;  %v563_v10 = vadd.f32 0.11098505, %v555_v0  ;;  %v530_v11 = vadd.f32 0.0010179626, %v522_v1  ;;  %v440_v13 = vadd.f32 0.003408291, %v432_v58 }
 0x133   :  { %v569_v53 = vmul.f32 %v561_v40, %v1452_v48  ;;  %v574_v12 = vadd.f32 0.49746925, %v566_v57  ;;  %v508_v16 = vmul.f32 -1.1791603e-07, %v1502_v59  ;;  %v573_v18 = vadd.f32 0.49746925, %v565_v61 }
 0x134   :  { %v559_v23 = vadd.f32 0.11098505, %v551_v56  ;;  %v449_v14 = vmul.f32 %v441_v62, %v1452_v48  ;;  %v435_v24 = vmul.f32 0.00022905065, %v1467_v2  ;;  %v453_v25 = vadd.f32 0.050955694, %v445_v3 }
 0x135   :  { %v577_v9 = vadd.f32 0.49746925, %v569_v53  ;;  %v447_v27 = vmul.f32 %v439_v4, %v1440_v37  ;;  %v442_v34 = vadd.f32 0.003408291, %v434_v6  ;;  %v538_v36 = vmul.f32 %v530_v11, %v1486_v33 }
 0x136   :  { %v454_v38 = vadd.f32 0.050955694, %v446_v8  ;;  %v568_v39 = vmul.f32 %v560_v5, %v1435_v35  ;;  %v571_v43 = vmul.f32 %v563_v10, %v1467_v2  ;;  %v582_v44 = vmul.f32 %v574_v12, %v1423_v29 }
 0x137   :  { %v585_v40 = vmul.f32 %v577_v9, %v1452_v48  ;;  %v448_v45 = vmul.f32 %v440_v13, %v1435_v35  ;;  %v546_v47 = vadd.f32 0.01407047, %v538_v36  ;;  %v516_v49 = vadd.f32 2.3547966e-05, %v508_v16 }
 0x138   :  { %v581_v50 = vmul.f32 %v573_v18, %v1419_v28  ;;  %v567_v51 = vmul.f32 %v559_v23, %v1440_v37  ;;  %v457_v52 = vadd.f32 0.050955694, %v449_v14  ;;  %v443_v53 = vadd.f32 0.003408291, %v435_v24 }
 0x139   :  { %v450_v54 = vmul.f32 %v442_v34, %v1486_v33  ;;  %v554_v55 = vmul.f32 %v546_v47, %v1486_v33  ;;  %v436_v56 = vmul.f32 0.00022905065, %v1502_v59  ;;  %v524_v57 = vmul.f32 %v516_v49, %v1502_v59 }
 0x13a   :  { %v462_v58 = vmul.f32 %v454_v38, %v1423_v29  ;;  %v576_v61 = vadd.f32 0.49746925, %v568_v39  ;;  %v593_v62 = vadd.f32 1.0, %v585_v40  ;;  %v579_v0 = vadd.f32 0.49746925, %v571_v43 }
 0x13b   :  { %v461_v1 = vmul.f32 %v453_v25, %v1419_v28  ;;  %v590_v3 = vadd.f32 1.0, %v582_v44  ;;  %v562_v4 = vadd.f32 0.11098505, %v554_v55  ;;  %v532_v5 = vadd.f32 0.0010179626, %v524_v57 }
 0x13c   :  { %v589_v6 = vadd.f32 1.0, %v581_v50  ;;  %v575_v8 = vadd.f32 0.49746925, %v567_v51  ;;  %v465_v9 = vmul.f32 %v457_v52, %v1452_v48  ;;  %v451_v10 = vmul.f32 %v443_v53, %v1467_v2 }
 0x13d   :  { %v458_v11 = vadd.f32 0.050955694, %v450_v54  ;;  %v570_v12 = vmul.f32 %v562_v4, %v1486_v33  ;;  %v444_v13 = vadd.f32 0.003408291, %v436_v56  ;;  %v540_v16 = vmul.f32 %v532_v5, %v1502_v59 }
 0x13e   :  { %v470_v18 = vadd.f32 0.18520832, %v462_v58  ;;  %v456_v23 = vadd.f32 0.050955694, %v448_v45  ;;  %1223 = vrcp.f32 %v593_v62  ;;  %v587_v14 = vmul.f32 %v579_v0, %v1467_v2 }
 0x13f   :  { %1225 = vrcp.f32 %v590_v3  ;;  %v584_v24 = vmul.f32 %v576_v61, %v1435_v35  ;;  %v578_v25 = vadd.f32 0.49746925, %v570_v12  ;;  %v548_v34 = vadd.f32 0.01407047, %v540_v16 }
 0x140   :  { %1227 = vrcp.f32 %v589_v6  ;;  %v583_v36 = vmul.f32 %v575_v8, %v1440_v37  ;;  %v473_v38 = vadd.f32 0.18520832, %v465_v9  ;;  %v459_v39 = vadd.f32 0.050955694, %v451_v10 }
 0x141   :  { %v466_v40 = vmul.f32 %v458_v11, %v1486_v33  ;;  %v586_v43 = vmul.f32 %v578_v25, %v1486_v33  ;;  %v452_v44 = vmul.f32 %v444_v13, %v1502_v59  ;;  %v556_v45 = vmul.f32 %v548_v34, %v1502_v59 }
 0x142   :  { %v469_v47 = vadd.f32 0.18520832, %v461_v1  ;;  %v455_v49 = vadd.f32 0.050955694, %v447_v27  ;;  %v595_v50 = vadd.f32 1.0, %v587_v14  ;;  %v464_v51 = vmul.f32 %v456_v23, %v1435_v35 }
 0x143   :  { %v592_v52 = vadd.f32 1.0, %v584_v24  ;;  %v594_v53 = vadd.f32 1.0, %v586_v43  ;;  %v564_v54 = vadd.f32 0.11098505, %v556_v45  ;;  %v591_v55 = vadd.f32 1.0, %v583_v36 }
 0x144   :  { %v478_v56 = vmul.f32 %v470_v18, %v1423_v29  ;;  %v481_v57 = vmul.f32 %v473_v38, %v1452_v48  ;;  %v467_v58 = vmul.f32 %v459_v39, %v1467_v2  ;;  %v474_v61 = vadd.f32 0.18520832, %v466_v40 }
 0x145   :  { %1229 = vrcp.f32 %v594_v53  ;;  %v460_v62 = vadd.f32 0.050955694, %v452_v44  ;;  %v572_v0 = vmul.f32 %v564_v54, %v1502_v59  ;;  %v477_v27 = vmul.f32 %v469_v47, %v1419_v28 }
 0x146   :  { %v463_v1 = vmul.f32 %v455_v49, %v1440_v37  ;;  %1231 = vrcp.f32 %v595_v50  ;;  %v472_v4 = vadd.f32 0.18520832, %v464_v51  ;;  %v489_v5 = vadd.f32 1.1283791, %v481_v57 }
 0x147   :  { %1233 = vrcp.f32 %v592_v52  ;;  %v580_v3 = vadd.f32 0.49746925, %v572_v0  ;;  %v475_v29 = vadd.f32 0.18520832, %v467_v58  ;;  %v486_v6 = vadd.f32 1.1283791, %v478_v56 }
 0x148   :  { %1235 = vrcp.f32 %v591_v55  ;;  %v482_v48 = vmul.f32 %v474_v61, %v1486_v33  ;;  %v468_v8 = vmul.f32 %v460_v62, %v1502_v59  ;;  %v485_v10 = vadd.f32 1.1283791, %v477_v27 }
 0x149   :  { %v588_v9 = vmul.f32 %v580_v3, %v1502_v59  ;;  %v471_v11 = vadd.f32 0.18520832, %v463_v1  ;;  %v480_v16 = vmul.f32 %v472_v4, %v1435_v35  ;;  %v497_v18 = vmul.f32 %v1443_v41, %v489_v5 }
 0x14a   :  { %v483_v23 = vmul.f32 %v475_v29, %v1467_v2  ;;  %v494_v24 = vmul.f32 %v1415_v26, %v486_v6  ;;  %v490_v25 = vadd.f32 1.1283791, %v482_v48  ;;  %v476_v33 = vadd.f32 0.18520832, %v468_v8 }
 0x14b   :  { %v1224_v12 = vpop.eup %1223  ;;  %v596_v28 = vadd.f32 1.0, %v588_v9  ;;  %v493_v34 = vmul.f32 %v1410_v22, %v485_v10  ;;  %v479_v36 = vmul.f32 %v471_v11, %v1440_v37  ;;  %v488_v44 = vadd.f32 1.1283791, %v480_v16 }
 0x14c   :  { %v1226_v13 = vpop.eup %1225  ;;  %v609_v38 = vmul.f32 %v1224_v12, %v497_v18  ;;  %v491_v43 = vadd.f32 1.1283791, %v483_v23  ;;  %v498_v35 = vmul.f32 %v1477_v17, %v490_v25  ;;  %v484_v41 = vmul.f32 %v476_v33, %v1502_v59 }
 0x14d   :  { %v1228_v14 = vpop.eup %1227  ;;  %1237 = vrcp.f32 %v596_v28  ;;  %v606_v39 = vmul.f32 %v1226_v13, %v494_v24  ;;  %v487_v45 = vadd.f32 1.1283791, %v479_v36  ;;  %v390_v22 = vmul.f32 0.5, %v1406_v20 }
 0x14e   :  { %v605_v40 = vmul.f32 %v1228_v14, %v493_v34  ;;  %v617_v47 = vadd.f32 1.0, %v609_v38  ;;  %v393_v37 = vmul.f32 0.5, %v1427_v31  ;;  %v499_v53 = vmul.f32 %v1460_v60, %v491_v43 }
 0x14f   :  { %v614_v49 = vadd.f32 1.0, %v606_v39  ;;  %v496_v55 = vmul.f32 %v1425_v30, %v488_v44  ;;  %v394_v17 = vmul.f32 0.5, %v1463_v63  ;;  %v492_v56 = vadd.f32 1.1283791, %v484_v41 }
 0x150   :  { %v613_v52 = vadd.f32 1.0, %v605_v40  ;;  %v389_v57 = vmul.f32 0.5, %v1401_v15  ;;  %v495_v58 = vmul.f32 %v1429_v32, %v487_v45  ;;  %v625_v61 = vmul.f32 %v617_v47, %v393_v37 }
 0x151   :  { %v622_v0 = vmul.f32 %v614_v49, %v390_v22  ;;  %v500_v60 = vmul.f32 %v1489_v42, %v492_v56  ;;  %v395_v15 = vmul.f32 0.5, %v1448_v46  ;;  %v392_v32 = vmul.f32 0.5, %v1408_v21 }
 0x152   :  { %v1230_v2 = vpop.eup %1229  ;;  %v621_v1 = vmul.f32 %v613_v52, %v389_v57  ;;  %v396_v48 = vmul.f32 0.5, %v1470_v7  ;;  %v391_v9 = vmul.f32 0.5, %v1404_v19  ;;  %v1085_v19 = vld [vmem:[%s1579_s4] ss:$0 sm:$0xff] }
 0x153   :  { %v1232_v26 = vpop.eup %1231  ;;  %v610_v50 = vmul.f32 %v1230_v2, %v498_v35 }
 0x154   :  { %v1234_v51 = vpop.eup %1233  ;;  %v611_v62 = vmul.f32 %v1232_v26, %v499_v53  ;;  %v631_v30 = vpack.c.bf16 %v625_v61, %v621_v1 }
 0x155   :  { %v1236_v54 = vpop.eup %1235  ;;  %v618_v59 = vadd.f32 1.0, %v610_v50  ;;  %v608_v27 = vmul.f32 %v1234_v51, %v496_v55 }
 0x156   :  { %v607_v31 = vmul.f32 %v1236_v54, %v495_v58  ;;  %v619_v5 = vadd.f32 1.0, %v611_v62 }
 0x157   :  { %v626_v20 = vmul.f32 %v618_v59, %v394_v17  ;;  %v616_v63 = vadd.f32 1.0, %v608_v27 }
 0x158   :  { %v615_v6 = vadd.f32 1.0, %v607_v31  ;;  %v627_v10 = vmul.f32 %v619_v5, %v395_v15 }
 0x159   :  { %v632_v3 = vpack.c.bf16 %v626_v20, %v622_v0  ;;  %v624_v42 = vmul.f32 %v616_v63, %v392_v32 }
 0x15a   :  { %v1238_v4 = vpop.eup %1237  ;;  %v623_v12 = vmul.f32 %v615_v6, %v391_v9 }
 0x15b   :  { %v612_v29 = vmul.f32 %v1238_v4, %v500_v60  ;;  %923 = vmatprep.mubr.bf16.mxu0 %v632_v3 }
 0x15c   :  { %924 = vmatmul.mubr.bf16.vlgmr.msra.gmra.mxu0 %v631_v30  ;;  %v633_v13 = vpack.c.bf16 %v627_v10, %v623_v12 }
 0x15d   :  { %v620_v8 = vadd.f32 1.0, %v612_v29 }
 0x15f   :  { %v628_v11 = vmul.f32 %v620_v8, %v396_v48 }
 0x161   :  { %v634_v28 = vpack.c.bf16 %v628_v11, %v624_v42 }
 0x163   :  { %964 = vmatprep.mubr.bf16.mxu1 %v634_v28 }
 0x164   :  { %965 = vmatmul.mubr.bf16.vlgmr.msra.gmra.mxu1 %v633_v13 }
 0x21c   :  { %v1102_v16 = vpop.f32.mrf.mxu0 }
 0x21e   :  { %v1103_v18 = vpop.f32.mrf.mxu0 }
 0x21f   :  { %v1104_v14 = vadd.f32 %v1103_v18, %v1102_v16 }
 0x220   :  { %v1105_v23 = vpop.f32.mrf.mxu0 }
 0x222   :  { %v1106_v21 = vpop.f32.mrf.mxu0 }
 0x223   :  { %v1107_v34 = vadd.f32 %v1106_v21, %v1105_v23 }
 0x224   :  { %v1124_v46 = vpop.f32.mrf.mxu1 }
 0x226   :  { %v1125_v24 = vpop.f32.mrf.mxu1 }
 0x227   :  { %v1126_v25 = vadd.f32 %v1125_v24, %v1124_v46 }
 0x228   :  { %v1127_v7 = vpop.f32.mrf.mxu1 }
 0x229   :  { %v967_v33 = vadd.f32 %v1126_v25, %v1104_v14 }
 0x22a   :  { %v1128_v36 = vpop.f32.mrf.mxu1 }
 0x22b   :  { %v989_v38 = vadd.f32 %v1085_v19, %v967_v33  ;;  %v1129_v39 = vadd.f32 %v1128_v36, %v1127_v7 }
 0x22d   :  { %991 = vst [vmem:[#allocation11] sm:$0xff] %v989_v38  ;;  %v970_v40 = vadd.f32 %v1129_v39, %v1107_v34 }
 0x22f   :  { %v990_v43 = vadd.f32 %v1085_v19, %v970_v40 }
 0x231   :  { %992 = vst [vmem:[#allocation11 + $0x8] sm:$0xff] %v990_v43 }
 0x232   :  { %1330 = shalt.err (!%p1327_p10)
}
 0x233   :  { %s1357_s4 = smov 128   ;;  %s1358_s18 = smov 8  }
 0x234   :  { %1004 = dma.vmem_to_hbm [thread:$0]  %s999_s16, 256, %s1580_s5, [#allocation5], %s1357_s4, %s1357_s4, %s1358_s18  }
 0x235   :  { %1345 = dma.done.wait [#allocation5], 256  }
 0x236   :  { %1346 = vsyncadd [#allocation5], 4294967040 }
 0x237   :  { %1008 = vsyncpa [#allocation4], 1 }
 0x238   :  { %1009 = vsyncpa [#allocation7], 1 }
 0x239   :  { %1010 = vsyncpa [#allocation10], 1 }
 0x23a   :  { %1011 = vsyncpa [#allocation5], 1 }

</bundles_post_ra>
